<compile_context>
chip_gen: v6e
topology: v6e:2x2x1
jax: 0.10.0
libtpu: 0.0.40
codegen_flags: <defaults>
</compile_context>

<pallas_src>
import math
import functools

import numpy as np
import jax
import jax.numpy as jnp
from jax import lax
from jax.experimental import pallas as pl
from jax.experimental.pallas import tpu as pltpu

KE = 14.3996      # registered buffer "ke"
ALPHA = 0.2       # hard-coded alpha in the torch module

LANES = 128
SUBGROUPS_PER_TILE = 8                      # (8,128) sublane-groups per tile
PAIRS_PER_TILE = SUBGROUPS_PER_TILE * LANES  # 1024 pairs / grid step
NUM_PARALLEL_SPLITS = 2                      # leading "parallel" grid axis


def _erfc_poly(x):
    """erfc(x) for x >= 0 via Abramowitz & Stegun 7.1.26 (|err| ~ 1.5e-7)."""
    t = 1.0 / (1.0 + 0.3275911 * x)
    poly = t * (0.254829592 + t * (-0.284496736 + t * (1.421413741
             + t * (-1.453152027 + t * 1.061405429))))
    return poly * jnp.exp(-x * x)


def _fast_recip(x):
    """EUP approximate reciprocal + one Newton step (≈ f32 accuracy)."""
    r = pl.reciprocal(x, approx=True)
    return r * (2.0 - x * r)


def _isf_pair_kernel(cutoff, n_mol, pair_ref, mol_e_ref, mol_g_ref, acc_ref):
    """One pair-tile: per-pair physics + masked pair->molecule reductions.

    pair_ref : [8, S, 128]  rows: rx, ry, rz, q_ij, n_ij, log(r0), g_born, c^-n
    mol_e_ref: [M, S, 128]  row m = 1.0 where idx_m[idx_i] == m
    mol_g_ref: [M, S, 128]  row m = fj*[mol_j==m] - fi*[mol_i==m]
    acc_ref  : [M, 128]     cols 0:dsf-sum 1:born-sum 2..4:grad (accumulator)
    """
    f32 = jnp.float32
    c = f32(cutoff)
    alpha = f32(ALPHA)
    two_a_rpi = f32(2.0 * ALPHA / math.sqrt(math.pi))
    erfc_c_over_c = f32(math.erfc(ALPHA * cutoff) / cutoff)
    F_const = f32(math.erfc(ALPHA * cutoff) / cutoff ** 2
                  + 2.0 * ALPHA / math.sqrt(math.pi)
                  * math.exp(-ALPHA ** 2 * cutoff ** 2) / cutoff)

    @pl.when(pl.program_id(1) == 0)
    def _init():
        acc_ref[...] = jnp.zeros_like(acc_ref)

    rx = pair_ref[0]                     # each [S, 128], fully lane/sublane dense
    ry = pair_ref[1]
    rz = pair_ref[2]
    q_ij = pair_ref[3]
    n_ij = jnp.maximum(pair_ref[4], f32(1e-6))     # guard padded pairs
    lr0 = pair_ref[5]                    # log(r0_ij)
    g_born = pair_ref[6]                 # erfc(a r0)/r0^2 + 2a/sqrt(pi) e^{-a^2 r0^2}/r0 - F
    c_mn = pair_ref[7]                   # cutoff ** (-n_ij)

    # ---- pair geometry, cutoff mask (guard d=0 so NaN never propagates) ----
    d2 = rx * rx + ry * ry + rz * rz
    d = jnp.sqrt(d2)
    d_safe = jnp.maximum(d, f32(1e-6))
    inv_d = _fast_recip(d_safe)
    inv_d2 = inv_d * inv_d
    mask = (d < c).astype(f32)

    # ---- erfc(alpha*d); exp(-alpha^2 d^2) reused by the derivative ---------
    x = alpha * d_safe
    t = _fast_recip(1.0 + 0.3275911 * x)
    poly = t * (0.254829592 + t * (-0.284496736 + t * (1.421413741
             + t * (-1.453152027 + t * 1.061405429))))
    exp_md2 = jnp.exp(-(alpha * alpha) * d2)
    erfc_d = poly * exp_md2

    # ---- damped shifted-force (Coulomb) pair energy ------------------------
    e_dsf = q_ij * (erfc_d * inv_d - erfc_c_over_c + F_const * (d - c)) * mask

    # ---- Born repulsion -----------------------------------------------------
    inv_n = _fast_recip(n_ij)
    B_ij = jnp.exp((n_ij + 1.0) * lr0) * jnp.abs(q_ij) * inv_n * g_born
    dmn = jnp.exp(-n_ij * jnp.log(d_safe))           # d ** (-n_ij)
    e_born = B_ij * (dmn - c_mn) * mask

    # ---- analytic d/dd of the pair energies (reuses exp_md2, dmn) ----------
    de_dsf = q_ij * (F_const - two_a_rpi * exp_md2 * inv_d - erfc_d * inv_d2)
    de_born = -B_ij * n_ij * dmn * inv_d
    w = (de_dsf + de_born) * inv_d * mask            # d e / d shift prefactor

    # ---- pair -> molecule reductions (M is tiny: masked lane sums, no MXU) -
    mol_e = mol_e_ref[...]                           # [M, S, 128]
    mol_g = mol_g_ref[...]

    def mol_reduce(mask3, vals):
        prod = mask3 * vals[None]                    # [M, S, 128]
        s = jnp.sum(prod, axis=2)                    # [M, S]
        return jnp.sum(s, axis=1, keepdims=True)     # [M, 1]

    y_dsf = mol_reduce(mol_e, e_dsf)
    y_brn = mol_reduce(mol_e, e_born)
    gx = mol_reduce(mol_g, w * rx)
    gy = mol_reduce(mol_g, w * ry)
    gz = mol_reduce(mol_g, w * rz)

    lane = lax.broadcasted_iota(jnp.int32, (n_mol, LANES), 1)
    upd = (jnp.where(lane == 0, y_dsf, 0.0)
           + jnp.where(lane == 1, y_brn, 0.0)
           + jnp.where(lane == 2, gx, 0.0)
           + jnp.where(lane == 3, gy, 0.0)
           + jnp.where(lane == 4, gz, 0.0))
    acc_ref[...] = acc_ref[...] + upd


def ionic_shifted_force_potential(inputs, shift, r0_array, cutoff):
    """Returns (y_energy[M], y_coulomb[M], y_born[M], d(sum E)/d(shift)[M,3], None)."""
    f32 = jnp.float32
    c = float(cutoff)
    q = inputs["partial_charges"].reshape(-1).astype(f32)
    idx_m = inputs["idx_m"].astype(jnp.int32)
    z = inputs["Z"].astype(jnp.int32)
    ns = inputs["born_ns"].reshape(-1).astype(f32)
    idx_i = inputs["idx_i"].astype(jnp.int32)
    idx_j = inputs["idx_j"].astype(jnp.int32)
    is_film = inputs["is_film"].astype(jnp.int32)
    R = inputs["R"].astype(f32)
    offsets = inputs["offsets"].astype(f32)

    n_pairs = idx_i.shape[0]
    n_mol = shift.shape[0]

    # ---- host glue: O(P)/O(N) index gathers, tiny r0 tables ----------------
    film_f = is_film.astype(f32)
    R_shift = R + shift.astype(f32)[idx_m] * film_f[:, None]
    r_ij = R_shift[idx_j] - R_shift[idx_i] + offsets          # [P, 3]

    q_ij = q[idx_i] * q[idx_j]
    n_ij = 0.5 * (ns[idx_i] + ns[idx_j])

    F_const = (math.erfc(ALPHA * c) / c ** 2
               + 2.0 * ALPHA / math.sqrt(math.pi)
               * math.exp(-ALPHA ** 2 * c ** 2) / c)
    two_a_rpi = 2.0 * ALPHA / math.sqrt(math.pi)
    r0 = r0_array.astype(f32)
    g_table = (_erfc_poly(ALPHA * r0) / (r0 * r0)
               + two_a_rpi * jnp.exp(-(ALPHA ** 2) * r0 * r0) / r0
               - F_const)                                      # t1 + t2 - F
    lr0_table = jnp.log(r0)
    fidx = is_film[idx_i] + is_film[idx_j]
    g_pair = g_table[fidx, z[idx_i], z[idx_j]]
    lr0_pair = lr0_table[fidx, z[idx_i], z[idx_j]]

    # c^{-n_ij} factored per atom:  c^{-(ns_i+ns_j)/2} = c^{-ns_i/2} * c^{-ns_j/2}
    c_half = jnp.exp(-0.5 * ns * math.log(c))
    c_mn = c_half[idx_i] * c_half[idx_j]

    mol_i = idx_m[idx_i]
    mol_j = idx_m[idx_j]
    fi = film_f[idx_i]
    fj = film_f[idx_j]
    mids = jnp.arange(n_mol, dtype=jnp.int32)[:, None]         # [M, 1]
    mol_e = (mol_i[None, :] == mids).astype(f32)               # [M, P]
    mol_g = (fj[None, :] * (mol_j[None, :] == mids).astype(f32)
             - fi[None, :] * (mol_i[None, :] == mids).astype(f32))

    pair_feat = jnp.stack(
        [r_ij[:, 0], r_ij[:, 1], r_ij[:, 2], q_ij, n_ij,
         lr0_pair, g_pair, c_mn], axis=0)                      # [8, P]

    # ---- pad & fold pairs into (sublane-group, lane) tiles ------------------
    tiles = max(1, -(-n_pairs // PAIRS_PER_TILE))
    n_split = NUM_PARALLEL_SPLITS
    tiles_per_split = -(-tiles // n_split)
    p_pad = n_split * tiles_per_split * PAIRS_PER_TILE
    pad = p_pad - n_pairs
    pair_feat = jnp.pad(pair_feat, ((0, 0), (0, pad)))         # zero-pad: masked
    mol_e = jnp.pad(mol_e, ((0, 0), (0, pad)))
    mol_g = jnp.pad(mol_g, ((0, 0), (0, pad)))

    groups = p_pad // LANES
    pair_feat = pair_feat.reshape(8, groups, LANES)
    mol_e = mol_e.reshape(n_mol, groups, LANES)
    mol_g = mol_g.reshape(n_mol, groups, LANES)

    def tile_idx(s, t):
        return s * tiles_per_split + t

    acc = pl.pallas_call(
        functools.partial(_isf_pair_kernel, c, n_mol),
        grid=(n_split, tiles_per_split),
        in_specs=[
            pl.BlockSpec((8, SUBGROUPS_PER_TILE, LANES),
                         lambda s, t: (0, tile_idx(s, t), 0)),
            pl.BlockSpec((n_mol, SUBGROUPS_PER_TILE, LANES),
                         lambda s, t: (0, tile_idx(s, t), 0)),
            pl.BlockSpec((n_mol, SUBGROUPS_PER_TILE, LANES),
                         lambda s, t: (0, tile_idx(s, t), 0)),
        ],
        out_specs=pl.BlockSpec((None, n_mol, LANES), lambda s, t: (s, 0, 0)),
        out_shape=jax.ShapeDtypeStruct((n_split, n_mol, LANES), f32),
        compiler_params=pltpu.CompilerParams(
            dimension_semantics=("parallel", "arbitrary"),
            vmem_limit_bytes=32 * 1024 * 1024),
    )(pair_feat, mol_e, mol_g)

    acc = jnp.sum(acc, axis=0)                     # combine parallel splits [M,128]

    half_ke = 0.5 * KE
    self_const = math.erfc(ALPHA * c) / c + ALPHA / math.sqrt(math.pi)
    y_self = jnp.zeros((n_mol,), f32).at[idx_m].add(self_const * q * q)

    y_coulomb = half_ke * (acc[:, 0] - y_self)
    y_born = half_ke * acc[:, 1]
    y_energy = y_coulomb + y_born
    grad_shift = half_ke * acc[:, 2:5]
    return y_energy, y_coulomb, y_born, grad_shift, None


def _reference(inputs, shift, r0_array, cutoff):
    """Pure-JAX reference (same erfc polynomial) incl. jax.grad for the shift."""
    f32 = jnp.float32
    q = inputs["partial_charges"].reshape(-1).astype(f32)
    idx_m = inputs["idx_m"].astype(jnp.int32)
    z = inputs["Z"].astype(jnp.int32)
    ns = inputs["born_ns"].reshape(-1).astype(f32)
    idx_i = inputs["idx_i"].astype(jnp.int32)
    idx_j = inputs["idx_j"].astype(jnp.int32)
    is_film = inputs["is_film"].astype(jnp.int32)
    R = inputs["R"].astype(f32)
    offsets = inputs["offsets"].astype(f32)
    n_mol = shift.shape[0]

    c = float(cutoff)
    erfc_c_over_c = math.erfc(ALPHA * c) / c
    F_const = (math.erfc(ALPHA * c) / c ** 2
               + 2.0 * ALPHA / math.sqrt(math.pi)
               * math.exp(-ALPHA ** 2 * c ** 2) / c)
    self_const = math.erfc(ALPHA * c) / c + ALPHA / math.sqrt(math.pi)
    two_a_rpi = 2.0 * ALPHA / math.sqrt(math.pi)

    film_f = is_film.astype(f32)
    r0_pair = r0_array[is_film[idx_i] + is_film[idx_j], z[idx_i], z[idx_j]].astype(f32)
    n_ij = 0.5 * (ns[idx_i] + ns[idx_j])
    q_ij = q[idx_i] * q[idx_j]
    mol_pair = idx_m[idx_i]

    def parts(s):
        R_shift = R + s[idx_m] * film_f[:, None]
        r_ij = R_shift[idx_j] - R_shift[idx_i] + offsets
        d = jnp.sqrt(jnp.sum(r_ij * r_ij, axis=1))
        mask = (d < c).astype(f32)
        e_dsf = q_ij * (_erfc_poly(ALPHA * d) / d - erfc_c_over_c
                        + F_const * (d - c)) * mask
        pre = jnp.exp((n_ij + 1.0) * jnp.log(r0_pair)) * jnp.abs(q_ij) / n_ij
        t1 = _erfc_poly(ALPHA * r0_pair) / (r0_pair * r0_pair)
        t2 = two_a_rpi * jnp.exp(-ALPHA ** 2 * r0_pair ** 2) / r0_pair
        B_ij = pre * (t1 + t2 - F_const)                       # == -_calc_B(...)
        e_born = B_ij * (jnp.exp(-n_ij * jnp.log(d))
                         - jnp.exp(-n_ij * math.log(c))) * mask
        y_dsf = jnp.zeros((n_mol,), f32).at[mol_pair].add(e_dsf)
        y_brn = jnp.zeros((n_mol,), f32).at[mol_pair].add(e_born)
        y_self = jnp.zeros((n_mol,), f32).at[idx_m].add(self_const * q * q)
        y_coulomb = 0.5 * KE * (y_dsf - y_self)
        y_born = 0.5 * KE * y_brn
        return y_coulomb + y_born, y_coulomb, y_born

    y_e, y_c, y_b = parts(shift.astype(f32))
    g = jax.grad(lambda s: jnp.sum(parts(s)[0]))(shift.astype(f32))
    return y_e, y_c, y_b, g


if __name__ == "__main__":
    key = jax.random.PRNGKey(0)
    n_mol = 2                     # "molecules" (interface structures)
    atoms_per_mol = 8
    N = n_mol * atoms_per_mol     # 16 atoms total
    P = 64                        # candidate neighbour pairs
    z_max = 8
    cutoff = 4.0

    ks = jax.random.split(key, 8)
    gx, gy, gz = jnp.meshgrid(jnp.arange(4.0), jnp.arange(2.0), jnp.arange(2.0),
                              indexing="ij")
    base = 1.5 * jnp.stack([gx.ravel(), gy.ravel(), gz.ravel()], axis=1)   # [16,3]
    R = base + 0.2 * jax.random.uniform(ks[0], (N, 3), minval=-1.0, maxval=1.0)

    idx_m = jnp.repeat(jnp.arange(n_mol, dtype=jnp.int32), atoms_per_mol)
    n_atoms_per_mol = jnp.full((n_mol,), atoms_per_mol, dtype=jnp.int32)
    is_film = (jnp.arange(N, dtype=jnp.int32) % 2).astype(jnp.int32)

    z = jax.random.randint(ks[1], (N,), 0, z_max, dtype=jnp.int32)
    q_charges = jax.random.uniform(ks[2], (N, 1), minval=-1.0, maxval=1.0)
    born_ns = 6.0 + 4.0 * jax.random.uniform(ks[3], (N,))

    idx_i = jax.random.randint(ks[4], (P,), 0, N, dtype=jnp.int32)
    rand_off = jax.random.randint(ks[5], (P,), 1, N, dtype=jnp.int32)
    idx_j = (idx_i + rand_off) % N            # guarantees idx_i != idx_j
    offsets = 0.1 * jax.random.normal(ks[6], (P, 3))

    shift = 0.3 * jax.random.normal(ks[7], (n_mol, 3))
    r0_array = 1.5 + 0.5 * jax.random.uniform(jax.random.PRNGKey(1),
                                              (3, z_max, z_max))

    inputs = {
        "partial_charges": q_charges,
        "idx_m": idx_m,
        "Z": z,
        "born_ns": born_ns,
        "idx_i": idx_i,
        "idx_j": idx_j,
        "is_film": is_film,
        "R": R,
        "offsets": offsets,
        "n_atoms": n_atoms_per_mol,
    }

    y_e, y_c, y_b, g, _ = ionic_shifted_force_potential(inputs, shift, r0_array, cutoff)
    jax.block_until_ready((y_e, y_c, y_b, g))

    y_e_r, y_c_r, y_b_r, g_r = _reference(inputs, shift, r0_array, cutoff)
    np.testing.assert_allclose(np.asarray(y_e), np.asarray(y_e_r), rtol=5e-3, atol=5e-3)
    np.testing.assert_allclose(np.asarray(y_c), np.asarray(y_c_r), rtol=5e-3, atol=5e-3)
    np.testing.assert_allclose(np.asarray(y_b), np.asarray(y_b_r), rtol=5e-3, atol=5e-3)
    np.testing.assert_allclose(np.asarray(g), np.asarray(g_r), rtol=5e-3, atol=5e-3)

    print("KERNEL_OK")
</pallas_src>

<mosaic_0001>
module attributes {stable_mosaic.version = 11 : i64} {
  func.func @_isf_pair_kernel(%arg0: i32, %arg1: i32, %arg2: memref<8x8x128xf32, #tpu.memory_space<vmem>>, %arg3: memref<2x8x128xf32, #tpu.memory_space<vmem>>, %arg4: memref<2x8x128xf32, #tpu.memory_space<vmem>>, %arg5: memref<1x2x128xf32, #tpu.memory_space<vmem>>) attributes {dimension_semantics = [#tpu.dimension_semantics<parallel>, #tpu.dimension_semantics<arbitrary>], iteration_bounds = array<i64: 2, 1>, scalar_prefetch = 0 : i64, scratch_operands = 0 : i64, tpu.core_type = #tpu.core_type<tc>, window_params = [{transform_indices = @transform_0, window_bounds = array<i64: 8, 8, 128>}, {transform_indices = @transform_1, window_bounds = array<i64: 2, 8, 128>}, {transform_indices = @transform_2, window_bounds = array<i64: 2, 8, 128>}, {transform_indices = @transform_3, window_bounds = array<i64: 1, 2, 128>}]} {
    %c0_i32 = arith.constant 0 : i32
    %0 = arith.cmpi eq, %arg1, %c0_i32 : i32
    %1 = arith.extui %0 : i1 to i32
    %c0_i32_0 = arith.constant 0 : i32
    %2 = arith.cmpi ne, %1, %c0_i32_0 : i32
    scf.if %2 {
      %cst_69 = arith.constant 0.000000e+00 : f32
      %193 = vector.broadcast %cst_69 : f32 to vector<2x128xf32>
      %c0_70 = arith.constant 0 : index
      %c0_71 = arith.constant 0 : index
      %c0_72 = arith.constant 0 : index
      %194 = vector.load %arg5[%c0_70, %c0_71, %c0_72] : memref<1x2x128xf32, #tpu.memory_space<vmem>>, vector<1x2x128xf32>
      %195 = vector.shape_cast %194 : vector<1x2x128xf32> to vector<2x128xf32>
      %196 = vector.shape_cast %193 : vector<2x128xf32> to vector<1x2x128xf32>
      tpu.vector_store %arg5[%c0_70, %c0_71, %c0_72], %196 {strides = array<i32>} : memref<1x2x128xf32, #tpu.memory_space<vmem>>, vector<1x2x128xf32>,
    } else {
    }
    %c0 = arith.constant 0 : index
    %c0_1 = arith.constant 0 : index
    %c0_2 = arith.constant 0 : index
    %3 = vector.load %arg2[%c0, %c0_1, %c0_2] : memref<8x8x128xf32, #tpu.memory_space<vmem>>, vector<1x8x128xf32>
    %4 = vector.shape_cast %3 : vector<1x8x128xf32> to vector<8x128xf32>
    %c1 = arith.constant 1 : index
    %c0_3 = arith.constant 0 : index
    %c0_4 = arith.constant 0 : index
    %5 = vector.load %arg2[%c1, %c0_3, %c0_4] : memref<8x8x128xf32, #tpu.memory_space<vmem>>, vector<1x8x128xf32>
    %6 = vector.shape_cast %5 : vector<1x8x128xf32> to vector<8x128xf32>
    %c2 = arith.constant 2 : index
    %c0_5 = arith.constant 0 : index
    %c0_6 = arith.constant 0 : index
    %7 = vector.load %arg2[%c2, %c0_5, %c0_6] : memref<8x8x128xf32, #tpu.memory_space<vmem>>, vector<1x8x128xf32>
    %8 = vector.shape_cast %7 : vector<1x8x128xf32> to vector<8x128xf32>
    %c3 = arith.constant 3 : index
    %c0_7 = arith.constant 0 : index
    %c0_8 = arith.constant 0 : index
    %9 = vector.load %arg2[%c3, %c0_7, %c0_8] : memref<8x8x128xf32, #tpu.memory_space<vmem>>, vector<1x8x128xf32>
    %10 = vector.shape_cast %9 : vector<1x8x128xf32> to vector<8x128xf32>
    %c4 = arith.constant 4 : index
    %c0_9 = arith.constant 0 : index
    %c0_10 = arith.constant 0 : index
    %11 = vector.load %arg2[%c4, %c0_9, %c0_10] : memref<8x8x128xf32, #tpu.memory_space<vmem>>, vector<1x8x128xf32>
    %12 = vector.shape_cast %11 : vector<1x8x128xf32> to vector<8x128xf32>
    %cst = arith.constant 9.99999997E-7 : f32
    %13 = vector.broadcast %cst : f32 to vector<8x128xf32>
    %14 = arith.maximumf %12, %13 : vector<8x128xf32>
    %c5 = arith.constant 5 : index
    %c0_11 = arith.constant 0 : index
    %c0_12 = arith.constant 0 : index
    %15 = vector.load %arg2[%c5, %c0_11, %c0_12] : memref<8x8x128xf32, #tpu.memory_space<vmem>>, vector<1x8x128xf32>
    %16 = vector.shape_cast %15 : vector<1x8x128xf32> to vector<8x128xf32>
    %c6 = arith.constant 6 : index
    %c0_13 = arith.constant 0 : index
    %c0_14 = arith.constant 0 : index
    %17 = vector.load %arg2[%c6, %c0_13, %c0_14] : memref<8x8x128xf32, #tpu.memory_space<vmem>>, vector<1x8x128xf32>
    %18 = vector.shape_cast %17 : vector<1x8x128xf32> to vector<8x128xf32>
    %c7 = arith.constant 7 : index
    %c0_15 = arith.constant 0 : index
    %c0_16 = arith.constant 0 : index
    %19 = vector.load %arg2[%c7, %c0_15, %c0_16] : memref<8x8x128xf32, #tpu.memory_space<vmem>>, vector<1x8x128xf32>
    %20 = vector.shape_cast %19 : vector<1x8x128xf32> to vector<8x128xf32>
    %21 = arith.mulf %4, %4 : vector<8x128xf32>
    %22 = arith.mulf %6, %6 : vector<8x128xf32>
    %23 = arith.addf %21, %22 : vector<8x128xf32>
    %24 = arith.mulf %8, %8 : vector<8x128xf32>
    %25 = arith.addf %23, %24 : vector<8x128xf32>
    %26 = math.sqrt %25 : vector<8x128xf32>
    %cst_17 = arith.constant 9.99999997E-7 : f32
    %27 = vector.broadcast %cst_17 : f32 to vector<8x128xf32>
    %28 = arith.maximumf %26, %27 : vector<8x128xf32>
    %29 = tpu.reciprocal %28 {approx = true} : vector<8x128xf32> -> vector<8x128xf32>
    %30 = arith.mulf %28, %29 : vector<8x128xf32>
    %cst_18 = arith.constant 2.000000e+00 : f32
    %31 = vector.broadcast %cst_18 : f32 to vector<8x128xf32>
    %32 = arith.subf %31, %30 : vector<8x128xf32>
    %33 = arith.mulf %29, %32 : vector<8x128xf32>
    %34 = arith.mulf %33, %33 : vector<8x128xf32>
    %cst_19 = arith.constant 4.000000e+00 : f32
    %35 = vector.broadcast %cst_19 : f32 to vector<8x128xf32>
    %36 = arith.cmpf olt, %26, %35 : vector<8x128xf32>
    %37 = arith.extui %36 : vector<8x128xi1> to vector<8x128xi32>
    %38 = arith.sitofp %37 : vector<8x128xi32> to vector<8x128xf32>
    %cst_20 = arith.constant 2.000000e-01 : f32
    %39 = vector.broadcast %cst_20 : f32 to vector<8x128xf32>
    %40 = arith.mulf %39, %28 : vector<8x128xf32>
    %cst_21 = arith.constant 0.327591091 : f32
    %41 = vector.broadcast %cst_21 : f32 to vector<8x128xf32>
    %42 = arith.mulf %41, %40 : vector<8x128xf32>
    %cst_22 = arith.constant 1.000000e+00 : f32
    %43 = vector.broadcast %cst_22 : f32 to vector<8x128xf32>
    %44 = arith.addf %43, %42 : vector<8x128xf32>
    %45 = tpu.reciprocal %44 {approx = true} : vector<8x128xf32> -> vector<8x128xf32>
    %46 = arith.mulf %44, %45 : vector<8x128xf32>
    %cst_23 = arith.constant 2.000000e+00 : f32
    %47 = vector.broadcast %cst_23 : f32 to vector<8x128xf32>
    %48 = arith.subf %47, %46 : vector<8x128xf32>
    %49 = arith.mulf %45, %48 : vector<8x128xf32>
    %cst_24 = arith.constant 1.06140542 : f32
    %50 = vector.broadcast %cst_24 : f32 to vector<8x128xf32>
    %51 = arith.mulf %49, %50 : vector<8x128xf32>
    %cst_25 = arith.constant -1.45315206 : f32
    %52 = vector.broadcast %cst_25 : f32 to vector<8x128xf32>
    %53 = arith.addf %52, %51 : vector<8x128xf32>
    %54 = arith.mulf %49, %53 : vector<8x128xf32>
    %cst_26 = arith.constant 1.42141378 : f32
    %55 = vector.broadcast %cst_26 : f32 to vector<8x128xf32>
    %56 = arith.addf %55, %54 : vector<8x128xf32>
    %57 = arith.mulf %49, %56 : vector<8x128xf32>
    %cst_27 = arith.constant -0.284496725 : f32
    %58 = vector.broadcast %cst_27 : f32 to vector<8x128xf32>
    %59 = arith.addf %58, %57 : vector<8x128xf32>
    %60 = arith.mulf %49, %59 : vector<8x128xf32>
    %cst_28 = arith.constant 0.254829586 : f32
    %61 = vector.broadcast %cst_28 : f32 to vector<8x128xf32>
    %62 = arith.addf %61, %60 : vector<8x128xf32>
    %63 = arith.mulf %49, %62 : vector<8x128xf32>
    %cst_29 = arith.constant 2.000000e-01 : f32
    %cst_30 = arith.constant 2.000000e-01 : f32
    %64 = arith.mulf %cst_29, %cst_30 : f32
    %cst_31 = arith.constant 0.000000e+00 : f32
    %65 = arith.subf %cst_31, %64 : f32
    %66 = vector.broadcast %65 : f32 to vector<8x128xf32>
    %67 = arith.mulf %66, %25 : vector<8x128xf32>
    %68 = math.exp %67 : vector<8x128xf32>
    %69 = arith.mulf %63, %68 : vector<8x128xf32>
    %70 = arith.mulf %69, %33 : vector<8x128xf32>
    %cst_32 = arith.constant 0.0644747615 : f32
    %71 = vector.broadcast %cst_32 : f32 to vector<8x128xf32>
    %72 = arith.subf %70, %71 : vector<8x128xf32>
    %cst_33 = arith.constant 4.000000e+00 : f32
    %73 = vector.broadcast %cst_33 : f32 to vector<8x128xf32>
    %74 = arith.subf %26, %73 : vector<8x128xf32>
    %cst_34 = arith.constant 0.0458679795 : f32
    %75 = vector.broadcast %cst_34 : f32 to vector<8x128xf32>
    %76 = arith.mulf %75, %74 : vector<8x128xf32>
    %77 = arith.addf %72, %76 : vector<8x128xf32>
    %78 = arith.mulf %10, %77 : vector<8x128xf32>
    %79 = arith.mulf %78, %38 : vector<8x128xf32>
    %80 = tpu.reciprocal %14 {approx = true} : vector<8x128xf32> -> vector<8x128xf32>
    %81 = arith.mulf %14, %80 : vector<8x128xf32>
    %cst_35 = arith.constant 2.000000e+00 : f32
    %82 = vector.broadcast %cst_35 : f32 to vector<8x128xf32>
    %83 = arith.subf %82, %81 : vector<8x128xf32>
    %84 = arith.mulf %80, %83 : vector<8x128xf32>
    %cst_36 = arith.constant 1.000000e+00 : f32
    %85 = vector.broadcast %cst_36 : f32 to vector<8x128xf32>
    %86 = arith.addf %14, %85 : vector<8x128xf32>
    %87 = arith.mulf %86, %16 : vector<8x128xf32>
    %88 = math.exp %87 : vector<8x128xf32>
    %89 = math.absf %10 : vector<8x128xf32>
    %90 = arith.mulf %88, %89 : vector<8x128xf32>
    %91 = arith.mulf %90, %84 : vector<8x128xf32>
    %92 = arith.mulf %91, %18 : vector<8x128xf32>
    %cst_37 = arith.constant 0.000000e+00 : f32
    %93 = vector.broadcast %cst_37 : f32 to vector<8x128xf32>
    %94 = arith.subf %93, %14 : vector<8x128xf32>
    %95 = math.log %28 : vector<8x128xf32>
    %96 = arith.mulf %94, %95 : vector<8x128xf32>
    %97 = math.exp %96 : vector<8x128xf32>
    %98 = arith.subf %97, %20 : vector<8x128xf32>
    %99 = arith.mulf %92, %98 : vector<8x128xf32>
    %100 = arith.mulf %99, %38 : vector<8x128xf32>
    %cst_38 = arith.constant 0.225675836 : f32
    %101 = vector.broadcast %cst_38 : f32 to vector<8x128xf32>
    %102 = arith.mulf %101, %68 : vector<8x128xf32>
    %103 = arith.mulf %102, %33 : vector<8x128xf32>
    %cst_39 = arith.constant 0.0458679795 : f32
    %104 = vector.broadcast %cst_39 : f32 to vector<8x128xf32>
    %105 = arith.subf %104, %103 : vector<8x128xf32>
    %106 = arith.mulf %69, %34 : vector<8x128xf32>
    %107 = arith.subf %105, %106 : vector<8x128xf32>
    %108 = arith.mulf %10, %107 : vector<8x128xf32>
    %cst_40 = arith.constant 0.000000e+00 : f32
    %109 = vector.broadcast %cst_40 : f32 to vector<8x128xf32>
    %110 = arith.subf %109, %92 : vector<8x128xf32>
    %111 = arith.mulf %110, %14 : vector<8x128xf32>
    %112 = arith.mulf %111, %97 : vector<8x128xf32>
    %113 = arith.mulf %112, %33 : vector<8x128xf32>
    %114 = arith.addf %108, %113 : vector<8x128xf32>
    %115 = arith.mulf %114, %33 : vector<8x128xf32>
    %116 = arith.mulf %115, %38 : vector<8x128xf32>
    %c0_41 = arith.constant 0 : index
    %c0_42 = arith.constant 0 : index
    %c0_43 = arith.constant 0 : index
    %117 = vector.load %arg3[%c0_41, %c0_42, %c0_43] : memref<2x8x128xf32, #tpu.memory_space<vmem>>, vector<2x8x128xf32>
    %c0_44 = arith.constant 0 : index
    %c0_45 = arith.constant 0 : index
    %c0_46 = arith.constant 0 : index
    %118 = vector.load %arg4[%c0_44, %c0_45, %c0_46] : memref<2x8x128xf32, #tpu.memory_space<vmem>>, vector<2x8x128xf32>
    %119 = vector.shape_cast %79 : vector<8x128xf32> to vector<1x8x128xf32>
    %120 = vector.broadcast %119 : vector<1x8x128xf32> to vector<2x8x128xf32>
    %121 = arith.mulf %117, %120 : vector<2x8x128xf32>
    %cst_47 = arith.constant dense<0.000000e+00> : vector<2x8xf32>
    %122 = vector.multi_reduction <add>, %121, %cst_47 [2] : vector<2x8x128xf32> to vector<2x8xf32>
    %cst_48 = arith.constant dense<0.000000e+00> : vector<2xf32>
    %123 = vector.multi_reduction <add>, %122, %cst_48 [1] : vector<2x8xf32> to vector<2xf32>
    %124 = vector.shape_cast %123 : vector<2xf32> to vector<2x1xf32>
    %125 = vector.shape_cast %100 : vector<8x128xf32> to vector<1x8x128xf32>
    %126 = vector.broadcast %125 : vector<1x8x128xf32> to vector<2x8x128xf32>
    %127 = arith.mulf %117, %126 : vector<2x8x128xf32>
    %cst_49 = arith.constant dense<0.000000e+00> : vector<2x8xf32>
    %128 = vector.multi_reduction <add>, %127, %cst_49 [2] : vector<2x8x128xf32> to vector<2x8xf32>
    %cst_50 = arith.constant dense<0.000000e+00> : vector<2xf32>
    %129 = vector.multi_reduction <add>, %128, %cst_50 [1] : vector<2x8xf32> to vector<2xf32>
    %130 = vector.shape_cast %129 : vector<2xf32> to vector<2x1xf32>
    %131 = arith.mulf %116, %4 : vector<8x128xf32>
    %132 = vector.shape_cast %131 : vector<8x128xf32> to vector<1x8x128xf32>
    %133 = vector.broadcast %132 : vector<1x8x128xf32> to vector<2x8x128xf32>
    %134 = arith.mulf %118, %133 : vector<2x8x128xf32>
    %cst_51 = arith.constant dense<0.000000e+00> : vector<2x8xf32>
    %135 = vector.multi_reduction <add>, %134, %cst_51 [2] : vector<2x8x128xf32> to vector<2x8xf32>
    %cst_52 = arith.constant dense<0.000000e+00> : vector<2xf32>
    %136 = vector.multi_reduction <add>, %135, %cst_52 [1] : vector<2x8xf32> to vector<2xf32>
    %137 = vector.shape_cast %136 : vector<2xf32> to vector<2x1xf32>
    %138 = arith.mulf %116, %6 : vector<8x128xf32>
    %139 = vector.shape_cast %138 : vector<8x128xf32> to vector<1x8x128xf32>
    %140 = vector.broadcast %139 : vector<1x8x128xf32> to vector<2x8x128xf32>
    %141 = arith.mulf %118, %140 : vector<2x8x128xf32>
    %cst_53 = arith.constant dense<0.000000e+00> : vector<2x8xf32>
    %142 = vector.multi_reduction <add>, %141, %cst_53 [2] : vector<2x8x128xf32> to vector<2x8xf32>
    %cst_54 = arith.constant dense<0.000000e+00> : vector<2xf32>
    %143 = vector.multi_reduction <add>, %142, %cst_54 [1] : vector<2x8xf32> to vector<2xf32>
    %144 = vector.shape_cast %143 : vector<2xf32> to vector<2x1xf32>
    %145 = arith.mulf %116, %8 : vector<8x128xf32>
    %146 = vector.shape_cast %145 : vector<8x128xf32> to vector<1x8x128xf32>
    %147 = vector.broadcast %146 : vector<1x8x128xf32> to vector<2x8x128xf32>
    %148 = arith.mulf %118, %147 : vector<2x8x128xf32>
    %cst_55 = arith.constant dense<0.000000e+00> : vector<2x8xf32>
    %149 = vector.multi_reduction <add>, %148, %cst_55 [2] : vector<2x8x128xf32> to vector<2x8xf32>
    %cst_56 = arith.constant dense<0.000000e+00> : vector<2xf32>
    %150 = vector.multi_reduction <add>, %149, %cst_56 [1] : vector<2x8xf32> to vector<2xf32>
    %151 = vector.shape_cast %150 : vector<2xf32> to vector<2x1xf32>
    %152 = tpu.iota {dimensions = array<i32: 1>} : vector<2x128xi32>
    %c0_i32_57 = arith.constant 0 : i32
    %153 = vector.broadcast %c0_i32_57 : i32 to vector<2x128xi32>
    %154 = arith.cmpi eq, %152, %153 : vector<2x128xi32>
    %cst_58 = arith.constant 0.000000e+00 : f32
    %155 = vector.shape_cast %124 : vector<2x1xf32> to vector<2x1xf32>
    %156 = vector.broadcast %155 : vector<2x1xf32> to vector<2x128xf32>
    %157 = vector.broadcast %cst_58 : f32 to vector<2x128xf32>
    %158 = arith.select %154, %156, %157 : vector<2x128xi1>, vector<2x128xf32>
    %c1_i32 = arith.constant 1 : i32
    %159 = vector.broadcast %c1_i32 : i32 to vector<2x128xi32>
    %160 = arith.cmpi eq, %152, %159 : vector<2x128xi32>
    %cst_59 = arith.constant 0.000000e+00 : f32
    %161 = vector.shape_cast %130 : vector<2x1xf32> to vector<2x1xf32>
    %162 = vector.broadcast %161 : vector<2x1xf32> to vector<2x128xf32>
    %163 = vector.broadcast %cst_59 : f32 to vector<2x128xf32>
    %164 = arith.select %160, %162, %163 : vector<2x128xi1>, vector<2x128xf32>
    %165 = arith.addf %158, %164 : vector<2x128xf32>
    %c2_i32 = arith.constant 2 : i32
    %166 = vector.broadcast %c2_i32 : i32 to vector<2x128xi32>
    %167 = arith.cmpi eq, %152, %166 : vector<2x128xi32>
    %cst_60 = arith.constant 0.000000e+00 : f32
    %168 = vector.shape_cast %137 : vector<2x1xf32> to vector<2x1xf32>
    %169 = vector.broadcast %168 : vector<2x1xf32> to vector<2x128xf32>
    %170 = vector.broadcast %cst_60 : f32 to vector<2x128xf32>
    %171 = arith.select %167, %169, %170 : vector<2x128xi1>, vector<2x128xf32>
    %172 = arith.addf %165, %171 : vector<2x128xf32>
    %c3_i32 = arith.constant 3 : i32
    %173 = vector.broadcast %c3_i32 : i32 to vector<2x128xi32>
    %174 = arith.cmpi eq, %152, %173 : vector<2x128xi32>
    %cst_61 = arith.constant 0.000000e+00 : f32
    %175 = vector.shape_cast %144 : vector<2x1xf32> to vector<2x1xf32>
    %176 = vector.broadcast %175 : vector<2x1xf32> to vector<2x128xf32>
    %177 = vector.broadcast %cst_61 : f32 to vector<2x128xf32>
    %178 = arith.select %174, %176, %177 : vector<2x128xi1>, vector<2x128xf32>
    %179 = arith.addf %172, %178 : vector<2x128xf32>
    %c4_i32 = arith.constant 4 : i32
    %180 = vector.broadcast %c4_i32 : i32 to vector<2x128xi32>
    %181 = arith.cmpi eq, %152, %180 : vector<2x128xi32>
    %cst_62 = arith.constant 0.000000e+00 : f32
    %182 = vector.shape_cast %151 : vector<2x1xf32> to vector<2x1xf32>
    %183 = vector.broadcast %182 : vector<2x1xf32> to vector<2x128xf32>
    %184 = vector.broadcast %cst_62 : f32 to vector<2x128xf32>
    %185 = arith.select %181, %183, %184 : vector<2x128xi1>, vector<2x128xf32>
    %186 = arith.addf %179, %185 : vector<2x128xf32>
    %c0_63 = arith.constant 0 : index
    %c0_64 = arith.constant 0 : index
    %c0_65 = arith.constant 0 : index
    %187 = vector.load %arg5[%c0_63, %c0_64, %c0_65] : memref<1x2x128xf32, #tpu.memory_space<vmem>>, vector<1x2x128xf32>
    %188 = vector.shape_cast %187 : vector<1x2x128xf32> to vector<2x128xf32>
    %189 = arith.addf %188, %186 : vector<2x128xf32>
    %c0_66 = arith.constant 0 : index
    %c0_67 = arith.constant 0 : index
    %c0_68 = arith.constant 0 : index
    %190 = vector.load %arg5[%c0_66, %c0_67, %c0_68] : memref<1x2x128xf32, #tpu.memory_space<vmem>>, vector<1x2x128xf32>
    %191 = vector.shape_cast %190 : vector<1x2x128xf32> to vector<2x128xf32>
    %192 = vector.shape_cast %189 : vector<2x128xf32> to vector<1x2x128xf32>
    tpu.vector_store %arg5[%c0_66, %c0_67, %c0_68], %192 {strides = array<i32>} : memref<1x2x128xf32, #tpu.memory_space<vmem>>, vector<1x2x128xf32>,
    return
  }
  func.func @transform_0(%arg0: i32, %arg1: i32) -> (i32, i32, i32) {
    %c1_i32 = arith.constant 1 : i32
    %0 = arith.muli %arg0, %c1_i32 : i32
    %1 = arith.addi %0, %arg1 : i32
    %c0_i32 = arith.constant 0 : i32
    %c0_i32_0 = arith.constant 0 : i32
    %c0_i32_1 = arith.constant 0 : i32
    return %c0_i32, %1, %c0_i32_0 : i32, i32, i32
  }
  func.func @transform_1(%arg0: i32, %arg1: i32) -> (i32, i32, i32) {
    %c1_i32 = arith.constant 1 : i32
    %0 = arith.muli %arg0, %c1_i32 : i32
    %1 = arith.addi %0, %arg1 : i32
    %c0_i32 = arith.constant 0 : i32
    %c0_i32_0 = arith.constant 0 : i32
    %c0_i32_1 = arith.constant 0 : i32
    return %c0_i32, %1, %c0_i32_0 : i32, i32, i32
  }
  func.func @transform_2(%arg0: i32, %arg1: i32) -> (i32, i32, i32) {
    %c1_i32 = arith.constant 1 : i32
    %0 = arith.muli %arg0, %c1_i32 : i32
    %1 = arith.addi %0, %arg1 : i32
    %c0_i32 = arith.constant 0 : i32
    %c0_i32_0 = arith.constant 0 : i32
    %c0_i32_1 = arith.constant 0 : i32
    return %c0_i32, %1, %c0_i32_0 : i32, i32, i32
  }
  func.func @transform_3(%arg0: i32, %arg1: i32) -> (i32, i32, i32) {
    %c0_i32 = arith.constant 0 : i32
    %c0_i32_0 = arith.constant 0 : i32
    %c0_i32_1 = arith.constant 0 : i32
    return %arg0, %c0_i32, %c0_i32_0 : i32, i32, i32
  }
}

</mosaic_0001>

<bundles_post_ra>
// kernel: tpu_custom_call.1
= control target key start
LH: loop header
LB: loop body
LE: loop exit
PB: predicated region body
PF: predicated region fallthrough
CT: control target
= control target key end

     0   :  { %s1244_s0 = inlined_call_operand.hbm [shape: f32[8,16,128], index: 0, kind: input, shape index: {}]   ;;  %s1245_s1 = inlined_call_operand.hbm [shape: f32[2,16,128], index: 1, kind: input, shape index: {}]   ;;  %s1246_s2 = inlined_call_operand.hbm [shape: f32[2,16,128], index: 2, kind: input, shape index: {}]   ;;  %s1247_s3 = inlined_call_operand.hbm [shape: f32[2,2,128], index: 3, kind: output, shape index: {}]  }
   0x1   :  { %1257 = sst [smem:[#allocation16_spill]] %s1245_s1 }
   0x2   :  { %8 = vsyncpa [#allocation3], 0 }
   0x3   :  { %10 = vsyncpa [#allocation3 + $0x1], 0 }
   0x4   :  { %11 = vsyncpa [#allocation6], 0 }
   0x5   :  { %13 = vsyncpa [#allocation6 + $0x1], 0 }
   0x6   :  { %14 = vsyncpa [#allocation4], 0 }
   0x7   :  { %16 = vsyncpa [#allocation4 + $0x1], 0  ;;  %s980_s12 = smov 0   ;;  %s982_s13 = smov 0  }
   0x8   :  { %s984_s14 = smov 0   ;;  %s986_s15 = smov 0  }
   0x9   :  { %s988_s16 = smov 0   ;;  %s990_s17 = smov 0  }
   0xa LB: > { %1258 = sst [smem:[#allocation12_spill]] %s938_s14  ;;  %s1011_s18 = sadd.s32 4294967295, %s950_s17   ;;  %s950_s17 = sphi %s990_s17, %s22_s17   ;;  %s946_s16 = sphi %s988_s16, %s1276_s16   ;;  %s942_s15 = sphi %s986_s15, %s1275_s15   ;;  %s938_s14 = sphi %s984_s14, %s1274_s14   ;;  %s934_s13 = sphi %s982_s13, %s1278_s13   ;;  %s930_s12 = sphi %s980_s12, %s1277_s12  }
   0xb   : > { %1259 = sst [smem:[#allocation13_spill]] %s946_s16  ;;  %s662_s19 = sadd.s32 4294967294, %s950_s17  }
   0xc   : > { %s34_s20 = sadd.s32 1, %s946_s16  ;;  %s43_s21 = sadd.s32 1, %s938_s14 }
   0xd   : > { %p36_p0 = scmp.ge.s32.totalorder %s34_s20, 2  ;;  %p50_p1 = scmp.ne.s32.totalorder %s938_s14, %s934_s13 }
   0xe   : > { %p51_p2 = scmp.eq.s32.totalorder %s950_s17, 0  ;;  %p56_p3 = scmp.ne.s32.totalorder %s934_s13, %s930_s12 }
   0xf   : > { %s1280_s20 = smov (%p36_p0, %s34_s20), 0  ;;  %p57_p5 = scmp.eq.s32.totalorder %s1011_s18, 0 }
  0x10   : > { %1260 = sst [smem:[#allocation14_spill]] %s1280_s20  ;;  %p1023_p4 = por %p51_p2, %p50_p1 }
  0x11   : > { %s40_s23 = ssub.s32 %s946_s16, %s1280_s20  ;;  %p136_p6 = scmp.eq.s32.totalorder %s1011_s18, 1 }
  0x12   : > { %p41_p7 = scmp.eq.s32.totalorder %s40_s23, 0  ;;  %p1031_p8 = por %p57_p5, %p56_p3 }
  0x13   : > { %p1035_p9 = por %p136_p6, %p50_p1  ;;  %p142_p10 = scmp.eq.s32.totalorder %s662_s19, 1 }
  0x14   : > { %s1040_s26 = scalar_select %p41_p7, %s938_s14, %s43_s21  }
  0x15   : > { %p1042_p11 = por %p142_p10, %p56_p3  ;;  %p712_p13 = scmp.lt.s32.totalorder %s950_s17, 2 }
  0x16   : > { %1264 = sst [smem:[#allocation15_spill]] %s1040_s26  ;;  %s1049_s28 = sand.u32 1, %s938_s14  }
  0x17   : > { %s1052_s29 = sshll.u32 %s946_s16, 7  ;;  %p1056_p0 = pnand %p712_p13, %p1023_p4 }
  0x18   : > { %s183_s4 = sand.u32 1, %s950_s17   ;;  %s667_s5 = sshll.u32 %s1049_s28, 4 }
  0x19   : > { %s1267_s1 = sld [smem:[#allocation16_spill]]  ;;  %s187_s9 = scalar_lea.vmem [#allocation5], %s667_s5 }
  0x1a   : > { %s194_s10 = sshll.u32 %s187_s9, 4  ;;  %s208_s11 = scalar_lea.vmem [#allocation7], %s667_s5  ;;  %s195_s10 = int_to_ptr.vmem [resolvable:$true] %s194_s10 }
  0x1b   : > { %s215_s19 = sshll.u32 %s208_s11, 4  ;;  %s1066_s21 = scalar_lea.sflag [#allocation6], %s183_s4  ;;  %s1081_s19 = int_to_ptr.vmem [resolvable:$true] %s215_s19 }
  0x1c   : > { %p784_p1 = pneg %p1056_p0  ;;  %s795_s22 = scalar_lea.vmem %s195_s10, 256 }
  0x1d   : > { %p796_p2 = scmp.ne.s32.totalorder %s195_s10, %s795_s22  ;;  %s952_s23 = smov [#allocation5]  }
  0x1e   : > { %s800_s20 = sshll.u32 %s952_s23, 4  ;;  %s801_s20 = int_to_ptr.vmem [resolvable:$false] %s800_s20 }
  0x1f   : > { %s193_s8 = scalar_lea.hbm %s1267_s1, %s1052_s29  ;;  %p798_p3 = pnand %p796_p2, %p784_p1 }
  0x20   : > { %s802_s6 = scalar_lea.vmem %s801_s20, 512  ;;  %p803_p5 = scmp.lt.s32.totalorder %s195_s10, %s801_s20 }
  0x21   : > { %p799_p4 = pneg %p798_p3  ;;  %p804_p6 = scmp.lt.s32.totalorder %s802_s6, %s795_s22 }
  0x23   : > { %p805_p7 = por %p804_p6, %p803_p5 }
  0x25   : > { %p806_p10 = pnand %p805_p7, %p799_p4 }
  0x27   : > { %809 = shalt.err (!%p806_p10)
}
  0x28   : > { %s1251_s5 = smov 256   ;;  %s1253_s4 = smov 128  }
  0x29   : > { %s1255_s7 = smov 8   ;;  %p671_p13 = scmp.ge.s32.totalorder %s950_s17, 1 }
  0x2a   : > { %704 = dma.hbm_to_vmem [thread:$0]  (!%p1056_p0), %s193_s8, 256, %s195_s10, %s1066_s21, %s1251_s5, %s1253_s4, %s1255_s7  }
  0x2b   : > { %p223_p2 = scmp.lt.s32.totalorder %s950_s17, 3  ;;  %s665_s9 = sshll.u32 %s1049_s28, 6 }
  0x2c   : > { %s172_s23 = scalar_lea.hbm %s1244_s0, %s1052_s29  ;;  %s166_s6 = scalar_lea.vmem [#allocation2], %s665_s9 }
  0x2d   : > { %p1083_p3 = pnand %p671_p13, %p223_p2  ;;  %s173_s1 = sshll.u32 %s166_s6, 4  ;;  %s174_s1 = int_to_ptr.vmem [resolvable:$true] %s173_s1 }
  0x2e   : > { %s214_s14 = scalar_lea.hbm %s1246_s2, %s1052_s29  ;;  %s163_s8 = scalar_lea.sflag [#allocation3], %s1049_s28 }
  0x2f   : > { %s823_s10 = scalar_lea.vmem %s174_s1, 1024  ;;  %s956_s5 = smov [#allocation2]  }
  0x30   : > { %p824_p4 = scmp.ne.s32.totalorder %s174_s1, %s823_s10  ;;  %s828_s4 = sshll.u32 %s956_s5, 4  ;;  %s829_s4 = int_to_ptr.vmem [resolvable:$false] %s828_s4 }
  0x31   : > { %s830_s7 = scalar_lea.vmem %s829_s4, 2048  ;;  %p831_p7 = scmp.lt.s32.totalorder %s174_s1, %s829_s4 }
  0x32   : > { %p826_p5 = pnand %p824_p4, %p784_p1  ;;  %p832_p10 = scmp.lt.s32.totalorder %s830_s7, %s823_s10 }
  0x34   : > { %p827_p6 = pneg %p826_p5  ;;  %p833_p13 = por %p832_p10, %p831_p7 }
  0x36   : > { %p834_p2 = pnand %p833_p13, %p827_p6 }
  0x38   : > { %837 = shalt.err (!%p834_p2)
}
  0x39   : > { %s1269_s16 = smov 8   ;;  %s1270_s26 = smov 128  }
  0x3a   : > { %s1271_s28 = smov 256   ;;  %s851_s9 = scalar_lea.vmem %s1081_s19, 256 }
  0x3b   : > { %701 = dma.hbm_to_vmem [thread:$0]  (!%p1056_p0), %s172_s23, 1024, %s174_s1, %s163_s8, %s1271_s28, %s1270_s26, %s1269_s16  }
  0x3c   : > { %p852_p4 = scmp.ne.s32.totalorder %s1081_s19, %s851_s9  ;;  %s957_s5 = smov [#allocation7]  }
  0x3d   : > { %s856_s4 = sshll.u32 %s957_s5, 4  ;;  %s857_s4 = int_to_ptr.vmem [resolvable:$false] %s856_s4 }
  0x3e   : > { %p854_p5 = pnand %p852_p4, %p784_p1  ;;  %s858_s7 = scalar_lea.vmem %s857_s4, 512 }
  0x3f   : > { %p859_p6 = scmp.lt.s32.totalorder %s1081_s19, %s857_s4  ;;  %p860_p7 = scmp.lt.s32.totalorder %s858_s7, %s851_s9 }
  0x40   : > { %p855_p12 = pneg %p854_p5 }
  0x41   : > { %p861_p10 = por %p860_p7, %p859_p6 }
  0x43   : > { %p862_p13 = pnand %p861_p10, %p855_p12 }
  0x45   : > { %865 = shalt.err (!%p862_p13)
}
  0x46   : > { %707 = dma.hbm_to_vmem [thread:$0]  (!%p1056_p0), %s214_s14, 256, %s1081_s19, %s1066_s21, %s1271_s28, %s1270_s26, %s1269_s16  }
  0x47   : > { %227 = sbr.rel (%p1083_p3) target bundleno = 479 (0x1df), region = 32  ;;  %s1126_s22 = sand.u32 (!%p1083_p3), 1, %s934_s13  }
  0x48   : > { %s672_s30 = sshll.u32 (!%p1083_p3), %s1126_s22, 6  ;;  %s230_s23 = scalar_lea.sflag (!%p1083_p3), [#allocation3], %s1126_s22 }
  0x49   : > { %s1130_s6 = scalar_lea.vmem (!%p1083_p3), [#allocation2], %s672_s30 }
  0x4c   : > { %917 = dma.done.wait (%p1031_p8), %s230_s23, 1024  }
  0x4d   : > { %919 = vsyncadd (%p1031_p8), %s230_s23, 4294966272  ;;  %s238_s14 = sand.u32 1, %s1011_s18   ;;  %s673_s29 = sshll.u32 %s1126_s22, 4 }
  0x4e   : > { %s239_s19 = scalar_lea.sflag [#allocation6], %s238_s14  ;;  %s1140_s21 = scalar_lea.vmem [#allocation5], %s673_s29 }
  0x4f   : > { %921 = dma.done.wait (%p1031_p8), %s239_s19, 512  }
  0x50   : > { %923 = vsyncadd (%p1031_p8), %s239_s19, 4294966784  ;;  %s675_s20 = sshll.u32 %s1126_s22, 1  ;;  %v958_v0 = vmov 0.0   ;;  %v1152_v1 = vld [vmem:[%s1130_s6] sm:$0xff]  ;;  %v1155_v2 = vld [vmem:[%s1130_s6 + $0x8] sm:$0xff]  ;;  %s251_s18 = scalar_lea.vmem [#allocation7], %s673_s29 }
  0x51   : > { %s1147_s8 = scalar_lea.vmem [#allocation8], %s675_s20  ;;  %v1158_v3 = vld [vmem:[%s1130_s6 + $0x10] sm:$0xff]  ;;  %v308_v4 = vmul.f32 %v1152_v1, %v1152_v1  ;;  %v309_v5 = vmul.f32 %v1155_v2, %v1155_v2  ;;  %v679_v9 = vld [vmem:[%s1130_s6 + $0x20] sm:$0xff]  ;;  %v680_v16 = vld [vmem:[%s1130_s6 + $0x28] sm:$0xff]  ;;  %vm412_vm3 = vcmask 1041409   ;;  %vm415_vm4 = vcmask 58368  }
  0x52   : > { %291 = vst [vmem:[%s1147_s8] sm:$0x3] %v958_v0  ;;  %v311_v6 = vmul.f32 %v1158_v3, %v1158_v3  ;;  %v1167_v10 = vmax.f32 %v679_v9, 1e-06  ;;  %v678_v31 = vld [vmem:[%s1130_s6 + $0x18] sm:$0xff]  ;;  %v681_v47 = vld [vmem:[%s1130_s6 + $0x30] sm:$0xff]  ;;  %s687_s24 = sshll.u32 %s942_s15, 5 }
  0x53   : > { %v310_v7 = vadd.f32 %v309_v5, %v308_v4  ;;  %v364_v36 = vand.u32 2147483647, %v678_v31  ;;  %v682_v50 = vld [vmem:[%s1130_s6 + $0x38] sm:$0xff]  ;;  %v390_v63 = vld [vmem:[%s1140_s21] sm:$0xff]  ;;  %s537_s10 = sshll.u32 %s1147_s8, 4  ;;  %s535_s28 = scalar_lea.hbm %s1247_s3, %s687_s24  ;;  %s538_s10 = int_to_ptr.vmem [resolvable:$true] %s537_s10 }
  0x54   : > { %v360_v15 = vadd.f32 1.0, %v1167_v10  ;;  %v368_v25 = vsub.f32 0.0, %v1167_v10  ;;  %s524_s9 = scalar_lea.sflag [#allocation4], %s1126_s22  ;;  %s866_s5 = scalar_lea.vmem %s538_s10, 32 }
  0x55   : > { %v312_v8 = vadd.f32 %v311_v6, %v310_v7  ;;  %v391_v7 = vld [vmem:[%s1140_s21 + $0x8] sm:$0xff]  ;;  %p867_p8 = scmp.ne.s32.totalorder %s538_s10, %s866_s5  ;;  %s959_s4 = smov [#allocation8]  }
  0x56   : > { %v361_v19 = vmul.f32 %v680_v16, %v360_v15  ;;  %s870_s7 = sshll.u32 %s959_s4, 4  ;;  %s871_s7 = int_to_ptr.vmem [resolvable:$false] %s870_s7 }
  0x57   : > { %766 = vrsqrt.f32 %v312_v8  ;;  %vm315_vm0 = vcmp.eq.f32.partialorder %v312_v8, inf  ;;  %v318_v12 = vand.u32 2147483648, %v312_v8  ;;  %vm317_vm1 = vcmp.eq.f32.partialorder %v312_v8, 0.0  ;;  %p868_p12 = pnand %p867_p8, %p1035_p9  ;;  %s872_s1 = scalar_lea.vmem %s871_s7, 64 }
  0x58   : > { %768 = vrcp.f32 %v1167_v10  ;;  %v362_v22 = vmul.f32 1.442695, %v361_v19  ;;  %v345_v27 = vmul.f32 -0.040000003, %v312_v8  ;;  %p873_p1 = scmp.lt.s32.totalorder %s538_s10, %s871_s7  ;;  %p874_p3 = scmp.lt.s32.totalorder %s872_s1, %s866_s5 }
  0x59   : > { %p869_p0 = pneg %p868_p12 }
  0x5a   : > { %v346_v32 = vmul.f32 1.442695, %v345_v27  ;;  %p875_p2 = por %p874_p3, %p873_p1 }
  0x5c   : > { %p876_p4 = pnand %p875_p2, %p869_p0 }
  0x64   : > { %v767_v11 = vpop.eup %766 }
  0x65   : > { %v314_v13 = vmul.f32 %v767_v11, %v312_v8  ;;  %v769_v24 = vpop.eup %768 }
  0x66   : > { %v357_v29 = vmul.f32 %v769_v24, %v1167_v10 }
  0x67   : > { %v316_v14 = vsel %vm315_vm0, %v312_v8, %v314_v13 }
  0x68   : > { %v1171_v17 = vsel %vm317_vm1, %v318_v12, %v316_v14  ;;  %v358_v35 = vsub.f32 2.0, %v357_v29 }
  0x69   : > { %v320_v18 = vmax.f32 %v1171_v17, 1e-06  ;;  %vm326_vm2 = vcmp.lt.f32.partialorder %v1171_v17, 4.0 }
  0x6a   : > { %v359_v40 = vmul.f32 %v769_v24, %v358_v35  ;;  %v683_v58 = vsel %vm326_vm2, 1.0, %v958_v0  ;;  %v685_v0 = vadd.f32 -4.0, %v1171_v17  ;;  %v393_v17 = vld [vmem:[%s251_s18 + $0x8] sm:$0xff] }
  0x6b   : > { %770 = vlog2.f32 %v320_v18  ;;  %v329_v20 = vmul.f32 0.2, %v320_v18 }
  0x6d   : > { %v330_v21 = vmul.f32 0.3275911, %v329_v20 }
  0x6f   : > { %v331_v23 = vadd.f32 1.0, %v330_v21 }
  0x71   : > { %772 = vrcp.f32 %v331_v23 }
  0x72   : > { %774 = vpow2.f32 %v362_v22  ;;  %v352_v22 = vmul.f32 0.04586798, %v685_v0 }
  0x73   : > { %776 = vrcp.f32 %v320_v18 }
  0x78   : > { %v771_v26 = vpop.eup %770 }
  0x79   : > { %v370_v28 = vmul.f32 0.6931472, %v771_v26 }
  0x7b   : > { %v371_v30 = vmul.f32 %v370_v28, %v368_v25 }
  0x7d   : > { %v372_v33 = vmul.f32 1.442695, %v371_v30 }
  0x7e   : > { %v773_v34 = vpop.eup %772 }
  0x7f   : > { %778 = vpow2.f32 %v372_v33  ;;  %v333_v37 = vmul.f32 %v773_v34, %v331_v23  ;;  %v775_v38 = vpop.eup %774 }
  0x80   : > { %780 = vpow2.f32 %v346_v32  ;;  %v365_v41 = vmul.f32 %v775_v38, %v364_v36  ;;  %v777_v44 = vpop.eup %776 }
  0x81   : > { %v334_v39 = vsub.f32 2.0, %v333_v37  ;;  %v322_v48 = vmul.f32 %v777_v44, %v320_v18  ;;  %v392_v37 = vld [vmem:[%s251_s18] sm:$0xff] }
  0x82   : > { %v366_v45 = vmul.f32 %v365_v41, %v359_v40 }
  0x83   : > { %v335_v42 = vmul.f32 %v773_v34, %v334_v39  ;;  %v323_v55 = vsub.f32 2.0, %v322_v48 }
  0x84   : > { %v367_v51 = vmul.f32 %v681_v47, %v366_v45 }
  0x85   : > { %v336_v43 = vmul.f32 1.0614054, %v335_v42  ;;  %v324_v5 = vmul.f32 %v777_v44, %v323_v55  ;;  %v402_v44 = vlaneseq }
  0x86   : > { %v383_v61 = vsub.f32 0.0, %v367_v51 }
  0x87   : > { %v337_v46 = vadd.f32 -1.4531521, %v336_v43  ;;  %v325_v13 = vmul.f32 %v324_v5, %v324_v5  ;;  %v405_v45 = vshrl.u32 %v402_v44, 7 }
  0x88   : > { %v384_v8 = vmul.f32 %v383_v61, %v1167_v10 }
  0x89   : > { %v338_v49 = vmul.f32 %v337_v46, %v335_v42 }
  0x8b   : > { %v339_v52 = vadd.f32 1.4214138, %v338_v49 }
  0x8c   : > { %v779_v53 = vpop.eup %778 }
  0x8d   : > { %v374_v54 = vsub.f32 %v779_v53, %v682_v50  ;;  %v340_v56 = vmul.f32 %v339_v52, %v335_v42  ;;  %v781_v57 = vpop.eup %780  ;;  %v385_v16 = vmul.f32 %v779_v53, %v384_v8 }
  0x8e   : > { %v377_v60 = vmul.f32 0.22567584, %v781_v57 }
  0x8f   : > { %v375_v59 = vmul.f32 %v374_v54, %v367_v51  ;;  %v341_v62 = vadd.f32 -0.28449672, %v340_v56  ;;  %v386_v24 = vmul.f32 %v385_v16, %v324_v5 }
  0x90   : > { %v378_v12 = vmul.f32 %v377_v60, %v324_v5 }
  0x91   : > { %v376_v4 = vmul.f32 %v683_v58, %v375_v59  ;;  %v342_v6 = vmul.f32 %v341_v62, %v335_v42 }
  0x92   : > { %v379_v19 = vsub.f32 0.04586798, %v378_v12 }
  0x93   : > { %v419_v9 = vmul.f32 %v390_v63, %v376_v4  ;;  %v343_v11 = vadd.f32 0.2548296, %v342_v6  ;;  %v420_v15 = vmul.f32 %v391_v7, %v376_v4 }
  0x95   : > { %421 = vadd.xlane.f32.xlu1 %v419_v9  ;;  %v344_v14 = vmul.f32 %v343_v11, %v335_v42 }
  0x97   : > { %v348_v18 = vmul.f32 %v781_v57, %v344_v14 }
  0x99   : > { %v380_v20 = vmul.f32 %v348_v18, %v325_v13  ;;  %423 = vadd.xlane.f32.xlu1 %v420_v15  ;;  %v349_v21 = vmul.f32 %v348_v18, %v324_v5 }
  0x9b   : > { %v381_v23 = vsub.f32 %v379_v19, %v380_v20  ;;  %v684_v10 = vadd.f32 -0.06447476, %v349_v21 }
  0x9d   : > { %v382_v25 = vmul.f32 %v678_v31, %v381_v23  ;;  %v353_v26 = vadd.f32 %v684_v10, %v352_v22 }
  0x9f   : > { %v387_v27 = vadd.f32 %v386_v24, %v382_v25  ;;  %v354_v28 = vmul.f32 %v678_v31, %v353_v26 }
  0xa1   : > { %v388_v29 = vmul.f32 %v387_v27, %v324_v5  ;;  %v355_v30 = vmul.f32 %v683_v58, %v354_v28  ;;  %v520_v28 = vld [vmem:[%s1147_s8] sm:$0x3] }
  0xa3   : > { %v389_v32 = vmul.f32 %v683_v58, %v388_v29  ;;  %v394_v33 = vmul.f32 %v390_v63, %v355_v30  ;;  %v395_v34 = vmul.f32 %v391_v7, %v355_v30 }
  0xa5   : > { %396 = vadd.xlane.f32.xlu0 %v394_v33  ;;  %v440_v35 = vmul.f32 %v389_v32, %v1152_v1  ;;  %v462_v36 = vmul.f32 %v1155_v2, %v389_v32  ;;  %v484_v31 = vmul.f32 %v1158_v3, %v389_v32  ;;  %v403_v1 = vand.u32 127, %v402_v44 }
  0xa7   : > { %v442_v38 = vmul.f32 %v440_v35, %v393_v17  ;;  %v441_v39 = vmul.f32 %v440_v35, %v392_v37  ;;  %v464_v40 = vmul.f32 %v462_v36, %v393_v17  ;;  %v463_v41 = vmul.f32 %v462_v36, %v392_v37 }
  0xa8   : > { %v486_v42 = vmul.f32 %v484_v31, %v393_v17  ;;  %v485_v43 = vmul.f32 %v484_v31, %v392_v37  ;;  %v406_v2 = vsub.s32 %v403_v1, %v405_v45  ;;  %vm506_vm5 = vcmp.eq.s32.totalorder %v403_v1, 0 }
  0xa9   : > { %398 = vadd.xlane.f32.xlu0 %v395_v34  ;;  %445 = vadd.xlane.f32.xlu1 %v442_v38  ;;  %vm508_vm6 = vcmp.eq.s32.totalorder %v403_v1, 1  ;;  %vm511_vm7 = vcmp.eq.s32.totalorder %v403_v1, 2  ;;  %vm514_vm8 = vcmp.eq.s32.totalorder %v403_v1, 3  ;;  %vm517_vm9 = vcmp.eq.s32.totalorder %v403_v1, 4 }
  0xad   : > { %443 = vadd.xlane.f32.xlu0 %v441_v39  ;;  %467 = vadd.xlane.f32.xlu1 %v464_v40 }
  0xb1   : > { %465 = vadd.xlane.f32.xlu0 %v463_v41  ;;  %489 = vadd.xlane.f32.xlu1 %v486_v42 }
  0xb5   : > { %487 = vadd.xlane.f32.xlu0 %v485_v43 }
 0x11e   : > { %v422_v46 = vpop.xlane.xlu1 %421 }
 0x11f   : > { %v430_v47 = vrot.slane %v422_v46, %v406_v2 }
 0x122   : > { %v424_v48 = vpop.xlane.xlu1 %423 }
 0x123   : > { %v434_v49 = vrot.slane %v424_v48, %v406_v2 }
 0x125   : > { %v435_v3 = vsel %vm412_vm3, %v434_v49, %v430_v47 }
 0x126   : > { %v437_v50 = vsel %vm415_vm4, %v435_v3, 0.0 }
 0x127   : > { %438 = vadd.xlane.f32.xlu1 %v437_v50 }
 0x12e   : > { %v397_v51 = vpop.xlane.xlu0 %396 }
 0x12f   : > { %v407_v54 = vrot.slane %v397_v51, %v406_v2 }
 0x132   : > { %v399_v52 = vpop.xlane.xlu0 %398  ;;  %v446_v53 = vpop.xlane.xlu1 %445 }
 0x133   : > { %v411_v55 = vrot.slane %v399_v52, %v406_v2  ;;  %v456_v56 = vrot.slane %v446_v53, %v406_v2 }
 0x135   : > { %v413_v57 = vsel %vm412_vm3, %v411_v55, %v407_v54 }
 0x136   : > { %v444_v58 = vpop.xlane.xlu0 %443  ;;  %v416_v59 = vsel %vm415_vm4, %v413_v57, 0.0  ;;  %v468_v60 = vpop.xlane.xlu1 %467 }
 0x137   : > { %v452_v61 = vrot.slane %v444_v58, %v406_v2  ;;  %417 = vadd.xlane.f32.xlu0 %v416_v59  ;;  %v478_v62 = vrot.slane %v468_v60, %v406_v2 }
 0x139   : > { %v457_v63 = vsel %vm412_vm3, %v456_v56, %v452_v61 }
 0x13a   : > { %v466_v4 = vpop.xlane.xlu0 %465  ;;  %v459_v5 = vsel %vm415_vm4, %v457_v63, 0.0  ;;  %v490_v6 = vpop.xlane.xlu1 %489 }
 0x13b   : > { %v474_v7 = vrot.slane %v466_v4, %v406_v2  ;;  %460 = vadd.xlane.f32.xlu0 %v459_v5  ;;  %v500_v8 = vrot.slane %v490_v6, %v406_v2 }
 0x13d   : > { %v479_v9 = vsel %vm412_vm3, %v478_v62, %v474_v7 }
 0x13e   : > { %v488_v11 = vpop.xlane.xlu0 %487  ;;  %v481_v12 = vsel %vm415_vm4, %v479_v9, 0.0 }
 0x13f   : > { %v496_v13 = vrot.slane %v488_v11, %v406_v2  ;;  %482 = vadd.xlane.f32.xlu1 %v481_v12 }
 0x141   : > { %v501_v14 = vsel %vm412_vm3, %v500_v8, %v496_v13 }
 0x142   : > { %v503_v15 = vsel %vm415_vm4, %v501_v14, 0.0 }
 0x143   : > { %504 = vadd.xlane.f32.xlu0 %v503_v15 }
 0x1b0   : > { %v439_v16 = vpop.xlane.xlu1 %438 }
 0x1b1   : > { %v509_v20 = vsel %vm508_vm6, %v439_v16, 0.0 }
 0x1c0   : > { %v418_v0 = vpop.xlane.xlu0 %417 }
 0x1c1   : > { %v507_v19 = vsel %vm506_vm5, %v418_v0, 0.0 }
 0x1c2   : > { %v510_v22 = vadd.f32 %v509_v20, %v507_v19 }
 0x1c4   : > { %v461_v18 = vpop.xlane.xlu0 %460 }
 0x1c5   : > { %v512_v21 = vsel %vm511_vm7, %v461_v18, 0.0 }
 0x1c6   : > { %v513_v10 = vadd.f32 %v512_v21, %v510_v22 }
 0x1c8   : > { %v483_v23 = vpop.xlane.xlu1 %482 }
 0x1c9   : > { %v515_v24 = vsel %vm514_vm8, %v483_v23, 0.0 }
 0x1ca   : > { %v516_v25 = vadd.f32 %v515_v24, %v513_v10 }
 0x1cc   : > { %v505_v26 = vpop.xlane.xlu0 %504 }
 0x1cd   : > { %v518_v27 = vsel %vm517_vm9, %v505_v26, 0.0 }
 0x1ce   : > { %v519_v29 = vadd.f32 %v518_v27, %v516_v25 }
 0x1d0   : > { %v521_v30 = vadd.f32 %v520_v28, %v519_v29 }
 0x1d2   : > { %522 = vst [vmem:[%s1147_s8] sm:$0x3] %v521_v30 }
 0x1d3   : > { %879 = shalt.err (!%p876_p4)
}
 0x1d4   : > { %s880_s15 = scalar_lea.hbm %s535_s28, 32  ;;  %s884_s30 = scalar_lea.hbm %s1247_s3, 64 }
 0x1d5   : > { %p881_p5 = scmp.ne.s32.totalorder %s535_s28, %s880_s15  ;;  %p885_p10 = scmp.lt.s32.totalorder %s535_s28, %s1247_s3 }
 0x1d6   : > { %p886_p13 = scmp.lt.s32.totalorder %s884_s30, %s880_s15 }
 0x1d7   : > { %p882_p6 = pnand %p881_p5, %p1035_p9 }
 0x1d8   : > { %p887_p8 = por %p886_p13, %p885_p10 }
 0x1d9   : > { %p883_p7 = pneg %p882_p6 }
 0x1db   : > { %p888_p12 = pnand %p887_p8, %p883_p7 }
 0x1dd   : > { %891 = shalt.err (!%p888_p12)
}
 0x1de   : > { %696 = dma.vmem_to_hbm [thread:$0]  (%p1035_p9), %s538_s10, 32, %s535_s28, %s524_s9  }
 0x1df PF: > { %s549_s14 = sand.u32 1, %s930_s12   ;;  %p1272_p0 = scmp.ge.s32.totalorder %s950_s17, 2 }
 0x1e0   : > { %s550_s29 = scalar_lea.sflag [#allocation4], %s549_s14 }
 0x1e1   : > { %p709_p1 = pnand %p1272_p0, %p1042_p11 }
 0x1e3   : > { %p710_p3 = pneg %p709_p1 }
 0x1e5   : > { %925 = dma.done.wait (%p710_p3), %s550_s29, 32  }
 0x1e6   : > { %927 = vsyncadd (%p710_p3), %s550_s29, 4294967264  ;;  %s22_s17 = sadd.s32 1, %s950_s17   ;;  %s1273_s19 = sld [smem:[#allocation12_spill]] }
 0x1e7   : > { %p19_p2 = scmp.ge.s32.totalorder %s22_s17, 4   ;;  %s1274_s14 = sld [smem:[#allocation15_spill]] }
 0x1e8   : > { %s1275_s15 = sld [smem:[#allocation13_spill]]  ;;  %s1277_s12 = smov %s934_s13 }
 0x1e9   : > { %s1276_s16 = sld [smem:[#allocation14_spill]]  ;;  %21 = sbr.rel (!%p19_p2) target bundleno = 10 (0xa), region = 112 }
 0x1ec   : > { %s1278_s13 = smov %s1273_s19 }
 0x1ee   :  { %555 = vsyncpa [#allocation3], 1 }
 0x1ef   :  { %557 = vsyncpa [#allocation3 + $0x1], 1 }
 0x1f0   :  { %558 = vsyncpa [#allocation6], 1 }
 0x1f1   :  { %560 = vsyncpa [#allocation6 + $0x1], 1 }
 0x1f2   :  { %561 = vsyncpa [#allocation4], 1 }
 0x1f3   :  { %563 = vsyncpa [#allocation4 + $0x1], 1 }

</bundles_post_ra>
